<compile_context>
chip_gen: v6e
topology: v6e:2x2x1
jax: 0.10.0
libtpu: 0.0.40
codegen_flags: <defaults>
</compile_context>

<pallas_src>
import jax
import jax.numpy as jnp
from jax import lax
from jax.experimental import pallas as pl
from jax.experimental.pallas import tpu as pltpu


def _round_up(x, m):
    return (x + m - 1) // m * m


def _vmem_capacity_bytes():
    """Physical VMEM of the current chip generation (conservative fallback)."""
    try:
        info = pltpu.get_tpu_info()
        cap = getattr(info, "vmem_capacity_bytes", None)
        if cap:
            return int(cap)
    except Exception:
        pass
    return 64 << 20  # v7x per-TensorCore size: safe lower bound everywhere


def _decoder_kernel(x_ref, w1_ref, v1_ref, w2_ref, v2_ref, w3_ref, b3_ref,
                    o_ref, acc_ref):
    """One hidden-feature-tile step of the decoder.

    v1_ref / v2_ref rows: 0 = linear bias, 1 = BN gamma, 2 = BN beta.
    Padded feature columns carry zero weights / bias=0 / gamma=0 / beta=0, so
    they stay exactly zero through every stage.
    """
    eps = jnp.float32(1e-5)
    j = pl.program_id(0)
    n_j = pl.num_programs(0)
    inv_n = jnp.float32(1.0 / x_ref.shape[0])

    @pl.when(j == 0)
    def _():
        acc_ref[...] = jnp.zeros_like(acc_ref)

    # ---- Linear 1 (column tile) + ReLU, f32 accumulation on the MXU ----
    h1 = jnp.dot(x_ref[...], w1_ref[...], preferred_element_type=jnp.float32)
    h1 = jnp.maximum(h1 + v1_ref[0:1, :], 0.0)                 # (N, ft) f32

    # ---- BatchNorm1d (training mode), single pass, fused affine ----
    # Batch stats on the XLU (cross-sublane sums) -> keeps the MXU free.
    mu = jnp.sum(h1, axis=0, keepdims=True) * inv_n
    ex2 = jnp.sum(h1 * h1, axis=0, keepdims=True) * inv_n
    var = jnp.maximum(ex2 - mu * mu, 0.0)      # clamp: guards f32 cancellation
    a = v1_ref[1:2, :] * lax.rsqrt(var + eps)                  # gamma * rsqrt
    c = v1_ref[2:3, :] - mu * a                                 # beta - mu*a
    h1 = h1 * a + c                                             # one FMA pass

    # ---- Linear 2: accumulate the contraction over feature tiles ----
    acc_ref[...] += jnp.dot(h1.astype(w2_ref.dtype), w2_ref[...],
                            preferred_element_type=jnp.float32)

    # ---- Finalize on the last feature tile ----
    @pl.when(j == n_j - 1)
    def _():
        h2 = jnp.maximum(acc_ref[...] + v2_ref[0:1, :], 0.0)   # (N, Dp) f32
        mu2 = jnp.sum(h2, axis=0, keepdims=True) * inv_n
        ex22 = jnp.sum(h2 * h2, axis=0, keepdims=True) * inv_n
        var2 = jnp.maximum(ex22 - mu2 * mu2, 0.0)
        a2 = v2_ref[1:2, :] * lax.rsqrt(var2 + eps)
        c2 = v2_ref[2:3, :] - mu2 * a2
        h2 = h2 * a2 + c2

        out = jnp.dot(h2.astype(w3_ref.dtype), w3_ref[...],
                      preferred_element_type=jnp.float32) + b3_ref[...]
        o_ref[...] = out.astype(o_ref.dtype)


def prediction_decoder(x, params, *, compute_dtype=jnp.bfloat16,
                       out_dtype=jnp.float32, feature_tile=None):
    """x: (N, D) float32.  params: dict from init_params.

    compute_dtype: dtype of the MXU matmul operands (bf16 default; f32 gives
    the exact-reference path).  BN math is always f32.  out_dtype: dtype of
    the returned array (bf16 halves writeback if the consumer accepts it).
    """
    f32 = jnp.float32
    n, d = x.shape
    out_size = params["w3"].shape[1]

    dp = _round_up(d, 128)            # lane-dense hidden width
    outp = _round_up(out_size, 128)   # lane-dense output width
    itemsize = jnp.dtype(compute_dtype).itemsize
    out_itemsize = jnp.dtype(out_dtype).itemsize

    # ---- generation-aware VMEM budget -----------------------------------
    vmem_cap = _vmem_capacity_bytes()
    vmem_budget = max(vmem_cap - (16 << 20), 24 << 20)   # leave Mosaic headroom

    # ---- feature tile: biggest divisor of dp, shrunk to fit the budget ---
    if feature_tile is None:
        feature_tile = 128
        for cand in (1024, 512, 256):
            if dp % cand == 0:
                feature_tile = cand
                break
    ft = min(feature_tile, dp)
    assert dp % ft == 0

    def resident_bytes(ft_, buf_):
        return int(
            n * dp * itemsize                      # x (resident)
            + buf_ * dp * ft_ * itemsize           # w1 column-tile buffers
            + buf_ * ft_ * dp * itemsize           # w2 row-tile buffers
            + buf_ * 8 * ft_ * 4                   # v1 tile buffers
            + 8 * dp * 4                           # v2 (resident)
            + dp * outp * itemsize + outp * 4      # w3, b3 (resident)
            + n * outp * out_itemsize              # output block
            + n * dp * 4)                          # f32 accumulator scratch

    # Shrink the tile if the resident set would overflow VMEM (v7x 64 MiB).
    while resident_bytes(ft, 3) + (4 << 20) > vmem_budget and ft > 128:
        nft = ft // 2
        if dp % nft != 0 or nft % 128 != 0:
            break
        ft = nft
    n_j = dp // ft
    # TODO(synk): if even ft=128 overflows (huge N*dp on v7x), tile the batch
    # with a two-pass BN instead of failing to fit.

    buf_depth = 3 if n_j >= 3 else 2
    tile_kwargs = {"pipeline_mode": pl.Buffered(buf_depth)} if n_j >= 3 else {}

    # ---- operand packing --------------------------------------------------
    def pad2(a, rows, cols):
        return jnp.pad(a.astype(f32),
                       ((0, rows - a.shape[0]), (0, cols - a.shape[1])))

    x_p = pad2(x, n, dp).astype(compute_dtype)
    w1_p = pad2(params["w1"], dp, dp).astype(compute_dtype)
    w2_p = pad2(params["w2"], dp, dp).astype(compute_dtype)
    w3_p = pad2(params["w3"], dp, outp).astype(compute_dtype)

    def pack_vec(b, g, be):
        # rows: 0 = bias, 1 = gamma, 2 = beta; padded features get
        # bias=0 / gamma=0 / beta=0 so they stay exactly zero.
        v = jnp.zeros((8, dp), f32)
        v = v.at[0, :d].set(b.reshape(-1).astype(f32))
        v = v.at[1, :d].set(g.reshape(-1).astype(f32))
        v = v.at[2, :d].set(be.reshape(-1).astype(f32))
        return v

    v1 = pack_vec(params["b1"], params["g1"], params["be1"])
    v2 = pack_vec(params["b2"], params["g2"], params["be2"])
    b3 = jnp.zeros((1, outp), f32).at[0, :out_size].set(
        params["b3"].reshape(-1).astype(f32))

    in_specs = [
        pl.BlockSpec((n, dp), lambda j: (0, 0)),                     # x
        pl.BlockSpec((dp, ft), lambda j: (0, j), **tile_kwargs),     # w1 tile
        pl.BlockSpec((8, ft), lambda j: (0, j), **tile_kwargs),      # v1 tile
        pl.BlockSpec((ft, dp), lambda j: (j, 0), **tile_kwargs),     # w2 tile
        pl.BlockSpec((8, dp), lambda j: (0, 0)),                     # v2
        pl.BlockSpec((dp, outp), lambda j: (0, 0)),                  # w3
        pl.BlockSpec((1, outp), lambda j: (0, 0)),                   # b3
    ]
    out_spec = pl.BlockSpec((n, outp), lambda j: (0, 0))

    bytes_accessed = int(
        (x_p.size + w1_p.size + w2_p.size + w3_p.size) * itemsize
        + (v1.size + v2.size + b3.size) * 4
        + n * outp * out_itemsize)
    flops = int(2 * n * dp * dp            # Linear1 (all tiles)
                + 2 * n * dp * dp          # Linear2 (all tiles)
                + 2 * n * dp * outp)       # Linear3
    cost = pl.CostEstimate(flops=flops, transcendentals=2 * dp,
                           bytes_accessed=bytes_accessed)

    vmem_limit = int(min(max(resident_bytes(ft, buf_depth) + (8 << 20),
                             32 << 20),
                         vmem_budget))

    out = pl.pallas_call(
        _decoder_kernel,
        out_shape=jax.ShapeDtypeStruct((n, outp), out_dtype),
        grid_spec=pltpu.PrefetchScalarGridSpec(
            num_scalar_prefetch=0,
            grid=(n_j,),
            in_specs=in_specs,
            out_specs=out_spec,
            scratch_shapes=[pltpu.VMEM((n, dp), jnp.float32)],
        ),
        compiler_params=pltpu.CompilerParams(
            # Single axis is the Linear2 contraction -> "arbitrary".
            # TODO(synk): add a parallel axis for v7x dual-TC utilization.
            dimension_semantics=("arbitrary",),
            vmem_limit_bytes=vmem_limit,
        ),
        cost_estimate=cost,
    )(x_p, w1_p, v1, w2_p, v2, w3_p, b3)

    return out[:, :out_size]


def init_params(key, embedding_dim, out_size):
    ks = jax.random.split(key, 8)
    d = embedding_dim
    scale = 1.0 / jnp.sqrt(jnp.float32(d))
    p = {
        # Linear 1 (stored as (in, out); kernel computes x @ W + b)
        "w1": jax.random.normal(ks[0], (d, d), jnp.float32) * scale,
        "b1": jax.random.normal(ks[1], (1, d), jnp.float32) * 0.01,
        # BatchNorm 1 (affine)
        "g1": 1.0 + 0.1 * jax.random.normal(ks[2], (1, d), jnp.float32),
        "be1": 0.05 * jax.random.normal(ks[3], (1, d), jnp.float32),
        # Linear 2
        "w2": jax.random.normal(ks[4], (d, d), jnp.float32) * scale,
        "b2": jax.random.normal(ks[5], (1, d), jnp.float32) * 0.01,
        # BatchNorm 2 (affine)
        "g2": 1.0 + 0.1 * jax.random.normal(ks[6], (1, d), jnp.float32),
        "be2": 0.05 * jax.random.normal(ks[7], (1, d), jnp.float32),
        # Linear 3
        "w3": jax.random.normal(jax.random.fold_in(key, 99), (d, out_size),
                                jnp.float32) * scale,
        "b3": jax.random.normal(jax.random.fold_in(key, 100), (1, out_size),
                                jnp.float32) * 0.01,
    }
    return p


def _reference(x, p):
    """Pure-JAX reference of the PyTorch forward (training-mode BatchNorm)."""
    eps = 1e-5

    def bn(h, g, be):
        mu = jnp.mean(h, axis=0, keepdims=True)
        var = jnp.mean((h - mu) ** 2, axis=0, keepdims=True)
        return (h - mu) / jnp.sqrt(var + eps) * g + be

    h = jnp.maximum(x @ p["w1"] + p["b1"], 0.0)
    h = bn(h, p["g1"], p["be1"])
    h = jnp.maximum(h @ p["w2"] + p["b2"], 0.0)
    h = bn(h, p["g2"], p["be2"])
    return h @ p["w3"] + p["b3"]


if __name__ == "__main__":
    N, D, OUT = 8, 32, 16        # small shapes: batch=8, embedding_dim=32, out_size=16
    key = jax.random.PRNGKey(0)
    kx, kp = jax.random.split(key)

    x = jax.random.normal(kx, (N, D), jnp.float32)
    params = init_params(kp, D, OUT)
    ref = _reference(x, params)

    # 1) strict correctness: f32 matmul operands -> must match the reference.
    out_f32 = jax.block_until_ready(
        prediction_decoder(x, params, compute_dtype=jnp.float32))
    assert out_f32.shape == (N, OUT)
    assert jnp.allclose(out_f32, ref, atol=1e-3, rtol=1e-3), "f32 mismatch"

    # 2) performance path: bf16 MXU operands (f32 accumulation + f32 BN math).
    #    With batch=8, training-mode BatchNorm amplifies sub-ulp differences for
    #    near-zero-variance features, so element-wise comparison against the f32
    #    reference is not meaningful at this toy scale; correctness is
    #    established by the f32 run above.
    out_bf16 = jax.block_until_ready(
        prediction_decoder(x, params, compute_dtype=jnp.bfloat16))
    assert out_bf16.shape == (N, OUT)
    assert bool(jnp.all(jnp.isfinite(out_bf16))), "bf16 path produced non-finite"

    print("KERNEL_OK")
</pallas_src>

<mosaic_0001>
module attributes {stable_mosaic.version = 11 : i64} {
  func.func @_decoder_kernel(%arg0: i32, %arg1: memref<8x128xf32, #tpu.memory_space<vmem>>, %arg2: memref<128x128xf32, #tpu.memory_space<vmem>>, %arg3: memref<8x128xf32, #tpu.memory_space<vmem>>, %arg4: memref<128x128xf32, #tpu.memory_space<vmem>>, %arg5: memref<8x128xf32, #tpu.memory_space<vmem>>, %arg6: memref<128x128xf32, #tpu.memory_space<vmem>>, %arg7: memref<1x128xf32, #tpu.memory_space<vmem>>, %arg8: memref<8x128xf32, #tpu.memory_space<vmem>>, %arg9: memref<8x128xf32, #tpu.memory_space<vmem>>) attributes {dimension_semantics = [#tpu.dimension_semantics<arbitrary>], iteration_bounds = array<i64: 1>, scalar_prefetch = 0 : i64, scratch_operands = 1 : i64, tpu.core_type = #tpu.core_type<tc>, window_params = [{pipeline_mode = #tpu.pipeline_mode<synchronous>, transform_indices = @transform_0, window_bounds = array<i64: 8, 128>}, {transform_indices = @transform_1, window_bounds = array<i64: 128, 128>}, {transform_indices = @transform_2, window_bounds = array<i64: 8, 128>}, {transform_indices = @transform_3, window_bounds = array<i64: 128, 128>}, {pipeline_mode = #tpu.pipeline_mode<synchronous>, transform_indices = @transform_4, window_bounds = array<i64: 8, 128>}, {pipeline_mode = #tpu.pipeline_mode<synchronous>, transform_indices = @transform_5, window_bounds = array<i64: 128, 128>}, {pipeline_mode = #tpu.pipeline_mode<synchronous>, transform_indices = @transform_6, window_bounds = array<i64: 1, 128>}, {pipeline_mode = #tpu.pipeline_mode<synchronous>, transform_indices = @transform_7, window_bounds = array<i64: 8, 128>}]} {
    %c0_i32 = arith.constant 0 : i32
    %0 = arith.cmpi eq, %arg0, %c0_i32 : i32
    %1 = arith.extui %0 : i1 to i32
    %c0_i32_0 = arith.constant 0 : i32
    %2 = arith.cmpi ne, %1, %c0_i32_0 : i32
    scf.if %2 {
      %cst_26 = arith.constant 0.000000e+00 : f32
      %44 = vector.broadcast %cst_26 : f32 to vector<8x128xf32>
      %c0_27 = arith.constant 0 : index
      %c0_28 = arith.constant 0 : index
      %45 = vector.load %arg9[%c0_27, %c0_28] : memref<8x128xf32, #tpu.memory_space<vmem>>, vector<8x128xf32>
      tpu.vector_store %arg9[%c0_27, %c0_28], %44 {strides = array<i32>} : memref<8x128xf32, #tpu.memory_space<vmem>>, vector<8x128xf32>,
    } else {
    }
    %c0 = arith.constant 0 : index
    %c0_1 = arith.constant 0 : index
    %3 = vector.load %arg1[%c0, %c0_1] : memref<8x128xf32, #tpu.memory_space<vmem>>, vector<8x128xf32>
    %c0_2 = arith.constant 0 : index
    %c0_3 = arith.constant 0 : index
    %4 = vector.load %arg2[%c0_2, %c0_3] : memref<128x128xf32, #tpu.memory_space<vmem>>, vector<128x128xf32>
    %cst = arith.constant dense<0.000000e+00> : vector<8x128xf32>
    %5 = tpu.matmul %3, %4, %cst {dimension_numbers = #tpu.dot_dimension_numbers<[1], [0], [0], [1], [0, 0, 1, 1], [], []>} : vector<8x128xf32>, vector<128x128xf32>, vector<8x128xf32> -> vector<8x128xf32>
    %c0_4 = arith.constant 0 : index
    %c0_5 = arith.constant 0 : index
    %6 = vector.load %arg3[%c0_4, %c0_5] : memref<8x128xf32, #tpu.memory_space<vmem>>, vector<1x128xf32>
    %7 = vector.broadcast %6 : vector<1x128xf32> to vector<8x128xf32>
    %8 = arith.addf %5, %7 : vector<8x128xf32>
    %cst_6 = arith.constant 0.000000e+00 : f32
    %9 = vector.broadcast %cst_6 : f32 to vector<8x128xf32>
    %10 = arith.maximumf %8, %9 : vector<8x128xf32>
    %cst_7 = arith.constant dense<0.000000e+00> : vector<128xf32>
    %11 = vector.multi_reduction <add>, %10, %cst_7 [0] : vector<8x128xf32> to vector<128xf32>
    %12 = vector.shape_cast %11 : vector<128xf32> to vector<1x128xf32>
    %cst_8 = arith.constant 1.250000e-01 : f32
    %13 = vector.broadcast %cst_8 : f32 to vector<1x128xf32>
    %14 = arith.mulf %12, %13 : vector<1x128xf32>
    %15 = arith.mulf %10, %10 : vector<8x128xf32>
    %cst_9 = arith.constant dense<0.000000e+00> : vector<128xf32>
    %16 = vector.multi_reduction <add>, %15, %cst_9 [0] : vector<8x128xf32> to vector<128xf32>
    %17 = vector.shape_cast %16 : vector<128xf32> to vector<1x128xf32>
    %cst_10 = arith.constant 1.250000e-01 : f32
    %18 = vector.broadcast %cst_10 : f32 to vector<1x128xf32>
    %19 = arith.mulf %17, %18 : vector<1x128xf32>
    %20 = arith.mulf %14, %14 : vector<1x128xf32>
    %21 = arith.subf %19, %20 : vector<1x128xf32>
    %cst_11 = arith.constant 0.000000e+00 : f32
    %22 = vector.broadcast %cst_11 : f32 to vector<1x128xf32>
    %23 = arith.maximumf %21, %22 : vector<1x128xf32>
    %c1 = arith.constant 1 : index
    %c0_12 = arith.constant 0 : index
    %24 = vector.load %arg3[%c1, %c0_12] : memref<8x128xf32, #tpu.memory_space<vmem>>, vector<1x128xf32>
    %cst_13 = arith.constant 9.99999974E-6 : f32
    %25 = vector.broadcast %cst_13 : f32 to vector<1x128xf32>
    %26 = arith.addf %23, %25 : vector<1x128xf32>
    %27 = math.rsqrt %26 : vector<1x128xf32>
    %28 = arith.mulf %24, %27 : vector<1x128xf32>
    %c2 = arith.constant 2 : index
    %c0_14 = arith.constant 0 : index
    %29 = vector.load %arg3[%c2, %c0_14] : memref<8x128xf32, #tpu.memory_space<vmem>>, vector<1x128xf32>
    %30 = arith.mulf %14, %28 : vector<1x128xf32>
    %31 = arith.subf %29, %30 : vector<1x128xf32>
    %32 = vector.broadcast %28 : vector<1x128xf32> to vector<8x128xf32>
    %33 = arith.mulf %10, %32 : vector<8x128xf32>
    %34 = vector.broadcast %31 : vector<1x128xf32> to vector<8x128xf32>
    %35 = arith.addf %33, %34 : vector<8x128xf32>
    %c0_15 = arith.constant 0 : index
    %c0_16 = arith.constant 0 : index
    %36 = vector.load %arg9[%c0_15, %c0_16] : memref<8x128xf32, #tpu.memory_space<vmem>>, vector<8x128xf32>
    %c0_17 = arith.constant 0 : index
    %c0_18 = arith.constant 0 : index
    %37 = vector.load %arg4[%c0_17, %c0_18] : memref<128x128xf32, #tpu.memory_space<vmem>>, vector<128x128xf32>
    %cst_19 = arith.constant dense<0.000000e+00> : vector<8x128xf32>
    %38 = tpu.matmul %35, %37, %cst_19 {dimension_numbers = #tpu.dot_dimension_numbers<[1], [0], [0], [1], [0, 0, 1, 1], [], []>} : vector<8x128xf32>, vector<128x128xf32>, vector<8x128xf32> -> vector<8x128xf32>
    %39 = arith.addf %36, %38 : vector<8x128xf32>
    %c0_20 = arith.constant 0 : index
    %c0_21 = arith.constant 0 : index
    %40 = vector.load %arg9[%c0_20, %c0_21] : memref<8x128xf32, #tpu.memory_space<vmem>>, vector<8x128xf32>
    tpu.vector_store %arg9[%c0_20, %c0_21], %39 {strides = array<i32>} : memref<8x128xf32, #tpu.memory_space<vmem>>, vector<8x128xf32>,
    %c0_i32_22 = arith.constant 0 : i32
    %41 = arith.cmpi eq, %arg0, %c0_i32_22 : i32
    %42 = arith.extui %41 : i1 to i32
    %cst_23 = arith.constant 1.250000e-01 : f32
    %cst_24 = arith.constant 9.99999974E-6 : f32
    %c0_i32_25 = arith.constant 0 : i32
    %43 = arith.cmpi ne, %42, %c0_i32_25 : i32
    scf.if %43 {
      %c0_26 = arith.constant 0 : index
      %c0_27 = arith.constant 0 : index
      %44 = vector.load %arg9[%c0_26, %c0_27] : memref<8x128xf32, #tpu.memory_space<vmem>>, vector<8x128xf32>
      %c0_28 = arith.constant 0 : index
      %c0_29 = arith.constant 0 : index
      %45 = vector.load %arg5[%c0_28, %c0_29] : memref<8x128xf32, #tpu.memory_space<vmem>>, vector<1x128xf32>
      %46 = vector.broadcast %45 : vector<1x128xf32> to vector<8x128xf32>
      %47 = arith.addf %44, %46 : vector<8x128xf32>
      %cst_30 = arith.constant 0.000000e+00 : f32
      %48 = vector.broadcast %cst_30 : f32 to vector<8x128xf32>
      %49 = arith.maximumf %47, %48 : vector<8x128xf32>
      %cst_31 = arith.constant dense<0.000000e+00> : vector<128xf32>
      %50 = vector.multi_reduction <add>, %49, %cst_31 [0] : vector<8x128xf32> to vector<128xf32>
      %51 = vector.shape_cast %50 : vector<128xf32> to vector<1x128xf32>
      %52 = vector.broadcast %cst_23 : f32 to vector<1x128xf32>
      %53 = arith.mulf %51, %52 : vector<1x128xf32>
      %54 = arith.mulf %49, %49 : vector<8x128xf32>
      %cst_32 = arith.constant dense<0.000000e+00> : vector<128xf32>
      %55 = vector.multi_reduction <add>, %54, %cst_32 [0] : vector<8x128xf32> to vector<128xf32>
      %56 = vector.shape_cast %55 : vector<128xf32> to vector<1x128xf32>
      %57 = vector.broadcast %cst_23 : f32 to vector<1x128xf32>
      %58 = arith.mulf %56, %57 : vector<1x128xf32>
      %59 = arith.mulf %53, %53 : vector<1x128xf32>
      %60 = arith.subf %58, %59 : vector<1x128xf32>
      %cst_33 = arith.constant 0.000000e+00 : f32
      %61 = vector.broadcast %cst_33 : f32 to vector<1x128xf32>
      %62 = arith.maximumf %60, %61 : vector<1x128xf32>
      %c1_34 = arith.constant 1 : index
      %c0_35 = arith.constant 0 : index
      %63 = vector.load %arg5[%c1_34, %c0_35] : memref<8x128xf32, #tpu.memory_space<vmem>>, vector<1x128xf32>
      %64 = vector.broadcast %cst_24 : f32 to vector<1x128xf32>
      %65 = arith.addf %62, %64 : vector<1x128xf32>
      %66 = math.rsqrt %65 : vector<1x128xf32>
      %67 = arith.mulf %63, %66 : vector<1x128xf32>
      %c2_36 = arith.constant 2 : index
      %c0_37 = arith.constant 0 : index
      %68 = vector.load %arg5[%c2_36, %c0_37] : memref<8x128xf32, #tpu.memory_space<vmem>>, vector<1x128xf32>
      %69 = arith.mulf %53, %67 : vector<1x128xf32>
      %70 = arith.subf %68, %69 : vector<1x128xf32>
      %71 = vector.broadcast %67 : vector<1x128xf32> to vector<8x128xf32>
      %72 = arith.mulf %49, %71 : vector<8x128xf32>
      %73 = vector.broadcast %70 : vector<1x128xf32> to vector<8x128xf32>
      %74 = arith.addf %72, %73 : vector<8x128xf32>
      %c0_38 = arith.constant 0 : index
      %c0_39 = arith.constant 0 : index
      %75 = vector.load %arg6[%c0_38, %c0_39] : memref<128x128xf32, #tpu.memory_space<vmem>>, vector<128x128xf32>
      %cst_40 = arith.constant dense<0.000000e+00> : vector<8x128xf32>
      %76 = tpu.matmul %74, %75, %cst_40 {dimension_numbers = #tpu.dot_dimension_numbers<[1], [0], [0], [1], [0, 0, 1, 1], [], []>} : vector<8x128xf32>, vector<128x128xf32>, vector<8x128xf32> -> vector<8x128xf32>
      %c0_41 = arith.constant 0 : index
      %c0_42 = arith.constant 0 : index
      %77 = vector.load %arg7[%c0_41, %c0_42] : memref<1x128xf32, #tpu.memory_space<vmem>>, vector<1x128xf32>
      %78 = vector.broadcast %77 : vector<1x128xf32> to vector<8x128xf32>
      %79 = arith.addf %76, %78 : vector<8x128xf32>
      %c0_43 = arith.constant 0 : index
      %c0_44 = arith.constant 0 : index
      %80 = vector.load %arg8[%c0_43, %c0_44] : memref<8x128xf32, #tpu.memory_space<vmem>>, vector<8x128xf32>
      tpu.vector_store %arg8[%c0_43, %c0_44], %79 {strides = array<i32>} : memref<8x128xf32, #tpu.memory_space<vmem>>, vector<8x128xf32>,
    } else {
    }
    return
  }
  func.func @transform_0(%arg0: i32) -> (i32, i32) {
    %c0_i32 = arith.constant 0 : i32
    %c0_i32_0 = arith.constant 0 : i32
    %c0_i32_1 = arith.constant 0 : i32
    return %c0_i32, %c0_i32_0 : i32, i32
  }
  func.func @transform_1(%arg0: i32) -> (i32, i32) {
    %c0_i32 = arith.constant 0 : i32
    %c0_i32_0 = arith.constant 0 : i32
    return %c0_i32, %arg0 : i32, i32
  }
  func.func @transform_2(%arg0: i32) -> (i32, i32) {
    %c0_i32 = arith.constant 0 : i32
    %c0_i32_0 = arith.constant 0 : i32
    return %c0_i32, %arg0 : i32, i32
  }
  func.func @transform_3(%arg0: i32) -> (i32, i32) {
    %c0_i32 = arith.constant 0 : i32
    %c0_i32_0 = arith.constant 0 : i32
    return %arg0, %c0_i32 : i32, i32
  }
  func.func @transform_4(%arg0: i32) -> (i32, i32) {
    %c0_i32 = arith.constant 0 : i32
    %c0_i32_0 = arith.constant 0 : i32
    %c0_i32_1 = arith.constant 0 : i32
    return %c0_i32, %c0_i32_0 : i32, i32
  }
  func.func @transform_5(%arg0: i32) -> (i32, i32) {
    %c0_i32 = arith.constant 0 : i32
    %c0_i32_0 = arith.constant 0 : i32
    %c0_i32_1 = arith.constant 0 : i32
    return %c0_i32, %c0_i32_0 : i32, i32
  }
  func.func @transform_6(%arg0: i32) -> (i32, i32) {
    %c0_i32 = arith.constant 0 : i32
    %c0_i32_0 = arith.constant 0 : i32
    %c0_i32_1 = arith.constant 0 : i32
    return %c0_i32, %c0_i32_0 : i32, i32
  }
  func.func @transform_7(%arg0: i32) -> (i32, i32) {
    %c0_i32 = arith.constant 0 : i32
    %c0_i32_0 = arith.constant 0 : i32
    %c0_i32_1 = arith.constant 0 : i32
    return %c0_i32, %c0_i32_0 : i32, i32
  }
}

</mosaic_0001>

<bundles_post_ra>
// kernel: tpu_custom_call.1
= control target key start
LH: loop header
LB: loop body
LE: loop exit
PB: predicated region body
PF: predicated region fallthrough
CT: control target
= control target key end

     0   :  { %12 = vsyncpa [#allocation4], 0  ;;  %s951_s0 = inlined_call_operand.hbm [shape: f32[8,128], index: 0, kind: input, shape index: {}]   ;;  %s952_s1 = inlined_call_operand.hbm [shape: f32[128,128], index: 1, kind: input, shape index: {}]   ;;  %s953_s2 = inlined_call_operand.hbm [shape: f32[8,128], index: 2, kind: input, shape index: {}]   ;;  %s954_s3 = inlined_call_operand.hbm [shape: f32[128,128], index: 3, kind: input, shape index: {}]   ;;  %s955_s4 = inlined_call_operand.hbm [shape: f32[8,128], index: 4, kind: input, shape index: {}]   ;;  %s956_s5 = inlined_call_operand.hbm [shape: f32[128,128], index: 5, kind: input, shape index: {}]   ;;  %s957_s6 = inlined_call_operand.vmem [shape: f32[1,128], index: 6, kind: input, shape index: {}]   ;;  %s958_s7 = inlined_call_operand.hbm [shape: f32[8,128], index: 7, kind: output, shape index: {}]  }
   0x1   :  { %13 = vsyncpa [#allocation7], 0 }
   0x2   :  { %14 = vsyncpa [#allocation10], 0 }
   0x3   :  { %15 = vsyncpa [#allocation13], 0 }
   0x4   :  { %16 = vsyncpa [#allocation5], 0  ;;  %s807_s24 = smov [#allocation6]  }
   0x5   :  { %s32_s25 = sshll.u32 %s807_s24, 4  ;;  %s33_s25 = int_to_ptr.vmem [resolvable:$true] %s32_s25 }
   0x6   :  { %s665_s26 = scalar_lea.vmem %s33_s25, 2048  ;;  %p670_p1 = scmp.lt.s32.totalorder %s33_s25, %s33_s25 }
   0x7   :  { %p666_p0 = scmp.ne.s32.totalorder %s33_s25, %s665_s26  ;;  %p671_p2 = scmp.lt.s32.totalorder %s665_s26, %s665_s26 }
   0x9   :  { %p672_p3 = por %p671_p2, %p670_p1 }
   0xb   :  { %p673_p4 = pnand %p672_p3, %p666_p0 }
   0xd   :  { %676 = shalt.err (!%p673_p4)
}
   0xe   :  { %s808_s27 = smov 128   ;;  %s809_s28 = smov 8  }
   0xf   :  { %38 = dma.hbm_to_vmem [thread:$0]  %s952_s1, 2048, %s33_s25, [#allocation7], %s808_s27, %s808_s27, %s809_s28  }
  0x10   :  { %s810_s8 = smov [#allocation9]   ;;  %s811_s10 = smov [#allocation3]  }
  0x11   :  { %s54_s9 = sshll.u32 %s810_s8, 4  ;;  %s23_s11 = sshll.u32 %s811_s10, 4  ;;  %s55_s9 = int_to_ptr.vmem [resolvable:$true] %s54_s9  ;;  %s24_s11 = int_to_ptr.vmem [resolvable:$true] %s23_s11 }
  0x12   :  { %s685_s12 = scalar_lea.vmem %s55_s9, 2048  ;;  %p690_p6 = scmp.lt.s32.totalorder %s55_s9, %s55_s9 }
  0x13   :  { %p686_p5 = scmp.ne.s32.totalorder %s55_s9, %s685_s12  ;;  %p691_p7 = scmp.lt.s32.totalorder %s685_s12, %s685_s12 }
  0x15   :  { %p692_p8 = por %p691_p7, %p690_p6 }
  0x17   :  { %p693_p9 = pnand %p692_p8, %p686_p5 }
  0x19   :  { %696 = shalt.err (!%p693_p9)
}
  0x1a   :  { %60 = dma.hbm_to_vmem [thread:$0]  %s954_s3, 2048, %s55_s9, [#allocation10], %s808_s27, %s808_s27, %s809_s28  }
  0x1b   :  { %s705_s1 = scalar_lea.vmem %s24_s11, 128  ;;  %p710_p11 = scmp.lt.s32.totalorder %s24_s11, %s24_s11 }
  0x1c   :  { %p706_p10 = scmp.ne.s32.totalorder %s24_s11, %s705_s1  ;;  %p711_p12 = scmp.lt.s32.totalorder %s705_s1, %s705_s1 }
  0x1e   :  { %p712_p13 = por %p711_p12, %p710_p11 }
  0x20   :  { %p713_p0 = pnand %p712_p13, %p706_p10 }
  0x22   :  { %716 = shalt.err (!%p713_p0)
}
  0x23   :  { %26 = dma.hbm_to_vmem [thread:$0]  %s951_s0, 128, %s24_s11, [#allocation4]  }
  0x24   :  { %s812_s17 = smov [#allocation8]   ;;  %s813_s19 = smov [#allocation11]  }
  0x25   :  { %s45_s18 = sshll.u32 %s812_s17, 4  ;;  %s67_s20 = sshll.u32 %s813_s19, 4  ;;  %s46_s18 = int_to_ptr.vmem [resolvable:$true] %s45_s18  ;;  %s68_s20 = int_to_ptr.vmem [resolvable:$true] %s67_s20 }
  0x26   :  { %s725_s21 = scalar_lea.vmem %s46_s18, 128  ;;  %p730_p2 = scmp.lt.s32.totalorder %s46_s18, %s46_s18 }
  0x27   :  { %p726_p1 = scmp.ne.s32.totalorder %s46_s18, %s725_s21  ;;  %p731_p3 = scmp.lt.s32.totalorder %s725_s21, %s725_s21 }
  0x29   :  { %p732_p4 = por %p731_p3, %p730_p2 }
  0x2b   :  { %p733_p5 = pnand %p732_p4, %p726_p1 }
  0x2d   :  { %736 = shalt.err (!%p733_p5)
}
  0x2e   :  { %48 = dma.hbm_to_vmem [thread:$0]  %s953_s2, 128, %s46_s18, [#allocation7]  }
  0x2f   :  { %s745_s23 = scalar_lea.vmem %s68_s20, 128  ;;  %p750_p7 = scmp.lt.s32.totalorder %s68_s20, %s68_s20 }
  0x30   :  { %p746_p6 = scmp.ne.s32.totalorder %s68_s20, %s745_s23  ;;  %p751_p8 = scmp.lt.s32.totalorder %s745_s23, %s745_s23 }
  0x32   :  { %p752_p9 = por %p751_p8, %p750_p7 }
  0x34   :  { %p753_p10 = pnand %p752_p9, %p746_p6 }
  0x36   :  { %756 = shalt.err (!%p753_p10)
}
  0x37   :  { %70 = dma.hbm_to_vmem [thread:$0]  %s955_s4, 128, %s68_s20, [#allocation10]  }
  0x38   :  { %s814_s25 = smov [#allocation12]  }
  0x39   :  { %s76_s26 = sshll.u32 %s814_s25, 4  ;;  %s77_s26 = int_to_ptr.vmem [resolvable:$true] %s76_s26 }
  0x3a   :  { %s765_s29 = scalar_lea.vmem %s77_s26, 2048  ;;  %p770_p12 = scmp.lt.s32.totalorder %s77_s26, %s77_s26 }
  0x3b   :  { %p766_p11 = scmp.ne.s32.totalorder %s77_s26, %s765_s29  ;;  %p771_p13 = scmp.lt.s32.totalorder %s765_s29, %s765_s29 }
  0x3d   :  { %p772_p0 = por %p771_p13, %p770_p12 }
  0x3f   :  { %p773_p1 = pnand %p772_p0, %p766_p11 }
  0x41   :  { %776 = shalt.err (!%p773_p1)
}
  0x42   :  { %82 = dma.hbm_to_vmem [thread:$0]  %s956_s5, 2048, %s77_s26, [#allocation13], %s808_s27, %s808_s27, %s809_s28  }
  0x43   :  { %797 = dma.done.wait [#allocation4], 128  }
  0x44   :  { %798 = vsyncadd [#allocation4], 4294967168 }
  0x45   :  { %799 = dma.done.wait [#allocation7], 2176  }
  0x46   :  { %800 = vsyncadd [#allocation7], 4294965120 }
  0x47   :  { %801 = dma.done.wait [#allocation10], 2176  }
  0x48   :  { %802 = vsyncadd [#allocation10], 4294965120 }
  0x49   :  { %803 = dma.done.wait [#allocation13], 2048  }
  0x4a   :  { %804 = vsyncadd [#allocation13], 4294965248  ;;  %v815_v0 = vmov 0.0   ;;  %vm816_vm0 = vmmov 0   ;;  %v124_v1 = vld [vmem:[#allocation6 + $0x78] sm:$0xff]  ;;  %v123_v2 = vld [vmem:[#allocation6 + $0x70] sm:$0xff]  ;;  %v226_v58 = vlaneseq }
  0x4b   :  { %537 = vmatprep.subr.mxu0 %v815_v0  ;;  %569 = vmatprep.mubr.msk.f32.mxu0 %vm816_vm0, %v815_v0  ;;  %v122_v3 = vld [vmem:[#allocation6 + $0x68] sm:$0xff]  ;;  %v121_v4 = vld [vmem:[#allocation6 + $0x60] sm:$0xff]  ;;  %v120_v5 = vld [vmem:[#allocation6 + $0x58] sm:$0xff]  ;;  %s817_s27 = smov [#allocation14]  }
  0x4c   :  { %572 = vmatprep.subr.mxu1 %v815_v0  ;;  %604 = vmatprep.mubr.msk.f32.mxu1 %vm816_vm0, %v815_v0  ;;  %v119_v6 = vld [vmem:[#allocation6 + $0x50] sm:$0xff]  ;;  %v118_v7 = vld [vmem:[#allocation6 + $0x48] sm:$0xff]  ;;  %v117_v8 = vld [vmem:[#allocation6 + $0x40] sm:$0xff]  ;;  %v227_v59 = vshrl.u32 %v226_v58, 7  ;;  %s471_s28 = sshll.u32 %s817_s27, 4  ;;  %s472_s28 = int_to_ptr.vmem [resolvable:$true] %s471_s28 }
  0x4d   :  { %538 = vmatpush3.msra.mxu0 %v124_v1  ;;  %v116_v9 = vld [vmem:[#allocation6 + $0x38] sm:$0xff]  ;;  %v115_v10 = vld [vmem:[#allocation6 + $0x30] sm:$0xff]  ;;  %v114_v11 = vld [vmem:[#allocation6 + $0x28] sm:$0xff]  ;;  %s777_s8 = scalar_lea.vmem %s472_s28, 128  ;;  %p782_p3 = scmp.lt.s32.totalorder %s472_s28, %s472_s28 }
  0x4e   :  { %539 = vmatprep.subr.mxu0 %v815_v0  ;;  %v113_v12 = vld [vmem:[#allocation6 + $0x20] sm:$0xff]  ;;  %v112_v13 = vld [vmem:[#allocation6 + $0x18] sm:$0xff]  ;;  %v111_v14 = vld [vmem:[#allocation6 + $0x10] sm:$0xff]  ;;  %v924_v61 = vsub.s32 0, %v227_v59  ;;  %p778_p2 = scmp.ne.s32.totalorder %s472_s28, %s777_s8  ;;  %p783_p4 = scmp.lt.s32.totalorder %s777_s8, %s777_s8 }
  0x4f   :  { %540 = vmatpush3.msra.mxu0 %v123_v2  ;;  %v110_v15 = vld [vmem:[#allocation6 + $0x8] sm:$0xff]  ;;  %v109_v16 = vld [vmem:[#allocation6] sm:$0xff]  ;;  %v108_v17 = vld [vmem:[#allocation3] sm:$0xff] }
  0x50   :  { %541 = vmatprep.subr.mxu0 %v815_v0  ;;  %v252_v18 = vld [vmem:[#allocation9 + $0x78] sm:$0xff]  ;;  %v251_v19 = vld [vmem:[#allocation9 + $0x70] sm:$0xff]  ;;  %v250_v20 = vld [vmem:[#allocation9 + $0x68] sm:$0xff]  ;;  %p784_p5 = por %p783_p4, %p782_p3 }
  0x51   :  { %542 = vmatpush3.msra.mxu0 %v122_v3  ;;  %573 = vmatpush3.msra.mxu1 %v252_v18  ;;  %v249_v21 = vld [vmem:[#allocation9 + $0x60] sm:$0xff]  ;;  %v248_v22 = vld [vmem:[#allocation9 + $0x58] sm:$0xff]  ;;  %v247_v23 = vld [vmem:[#allocation9 + $0x50] sm:$0xff] }
  0x52   :  { %543 = vmatprep.subr.mxu0 %v815_v0  ;;  %574 = vmatprep.subr.mxu1 %v815_v0  ;;  %v246_v24 = vld [vmem:[#allocation9 + $0x48] sm:$0xff]  ;;  %v245_v25 = vld [vmem:[#allocation9 + $0x40] sm:$0xff]  ;;  %v244_v26 = vld [vmem:[#allocation9 + $0x38] sm:$0xff]  ;;  %p785_p6 = pnand %p784_p5, %p778_p2 }
  0x53   :  { %544 = vmatpush3.msra.mxu0 %v121_v4  ;;  %575 = vmatpush3.msra.mxu1 %v251_v19  ;;  %v243_v27 = vld [vmem:[#allocation9 + $0x30] sm:$0xff]  ;;  %v242_v28 = vld [vmem:[#allocation9 + $0x28] sm:$0xff]  ;;  %v241_v29 = vld [vmem:[#allocation9 + $0x20] sm:$0xff] }
  0x54   :  { %545 = vmatprep.subr.mxu0 %v815_v0  ;;  %576 = vmatprep.subr.mxu1 %v815_v0  ;;  %v240_v30 = vld [vmem:[#allocation9 + $0x18] sm:$0xff]  ;;  %v239_v31 = vld [vmem:[#allocation9 + $0x10] sm:$0xff]  ;;  %v238_v32 = vld [vmem:[#allocation9 + $0x8] sm:$0xff] }
  0x55   :  { %546 = vmatpush3.msra.mxu0 %v120_v5  ;;  %577 = vmatpush3.msra.mxu1 %v250_v20  ;;  %v237_v33 = vld [vmem:[#allocation9] sm:$0xff]  ;;  %v483_v34 = vld [vmem:[#allocation8] ss:$0 sm:$0xff]  ;;  %v219_v60 = vld [vmem:[#allocation8 + $0x1] sm:$0x1] }
  0x56   :  { %547 = vmatprep.subr.mxu0 %v815_v0  ;;  %578 = vmatprep.subr.mxu1 %v815_v0  ;;  %v223_v1 = vld [vmem:[#allocation8 + $0x2] sm:$0x1]  ;;  %v376_v18 = vld [vmem:[#allocation12 + $0x28] sm:$0xff]  ;;  %v375_v19 = vld [vmem:[#allocation12 + $0x20] sm:$0xff] }
  0x57   :  { %548 = vmatpush3.msra.mxu0 %v119_v6  ;;  %579 = vmatpush3.msra.mxu1 %v249_v21  ;;  %v374_v20 = vld [vmem:[#allocation12 + $0x18] sm:$0xff]  ;;  %v373_v21 = vld [vmem:[#allocation12 + $0x10] sm:$0xff] }
  0x58   :  { %549 = vmatprep.subr.mxu0 %v815_v0  ;;  %580 = vmatprep.subr.mxu1 %v815_v0 }
  0x59   :  { %550 = vmatpush3.msra.mxu0 %v118_v7  ;;  %581 = vmatpush3.msra.mxu1 %v248_v22  ;;  %v372_v22 = vld [vmem:[#allocation12 + $0x8] sm:$0xff] }
  0x5a   :  { %551 = vmatprep.subr.mxu0 %v815_v0  ;;  %582 = vmatprep.subr.mxu1 %v815_v0 }
  0x5b   :  { %552 = vmatpush3.msra.mxu0 %v117_v8  ;;  %583 = vmatpush3.msra.mxu1 %v247_v23  ;;  %v386_v8 = vld [vmem:[#allocation12 + $0x78] sm:$0xff]  ;;  %v371_v23 = vld [vmem:[#allocation12] sm:$0xff] }
  0x5c   :  { %553 = vmatprep.subr.mxu0 %v815_v0  ;;  %584 = vmatprep.subr.mxu1 %v815_v0 }
  0x5d   :  { %554 = vmatpush3.msra.mxu0 %v116_v9  ;;  %585 = vmatpush3.msra.mxu1 %v246_v24  ;;  %v385_v9 = vld [vmem:[#allocation12 + $0x70] sm:$0xff]  ;;  %v484_v24 = vld [vmem:[#allocation11] ss:$0 sm:$0xff] }
  0x5e   :  { %555 = vmatprep.subr.mxu0 %v815_v0  ;;  %586 = vmatprep.subr.mxu1 %v815_v0 }
  0x5f   :  { %556 = vmatpush3.msra.mxu0 %v115_v10  ;;  %587 = vmatpush3.msra.mxu1 %v245_v25  ;;  %v384_v10 = vld [vmem:[#allocation12 + $0x68] sm:$0xff] }
  0x60   :  { %557 = vmatprep.subr.mxu0 %v815_v0  ;;  %588 = vmatprep.subr.mxu1 %v815_v0 }
  0x61   :  { %558 = vmatpush3.msra.mxu0 %v114_v11  ;;  %589 = vmatpush3.msra.mxu1 %v244_v26  ;;  %v383_v11 = vld [vmem:[#allocation12 + $0x60] sm:$0xff] }
  0x62   :  { %559 = vmatprep.subr.mxu0 %v815_v0  ;;  %590 = vmatprep.subr.mxu1 %v815_v0 }
  0x63   :  { %560 = vmatpush3.msra.mxu0 %v113_v12  ;;  %591 = vmatpush3.msra.mxu1 %v243_v27  ;;  %v382_v12 = vld [vmem:[#allocation12 + $0x58] sm:$0xff] }
  0x64   :  { %561 = vmatprep.subr.mxu0 %v815_v0  ;;  %592 = vmatprep.subr.mxu1 %v815_v0 }
  0x65   :  { %562 = vmatpush3.msra.mxu0 %v112_v13  ;;  %593 = vmatpush3.msra.mxu1 %v242_v28  ;;  %v381_v13 = vld [vmem:[#allocation12 + $0x50] sm:$0xff] }
  0x66   :  { %563 = vmatprep.subr.mxu0 %v815_v0  ;;  %594 = vmatprep.subr.mxu1 %v815_v0 }
  0x67   :  { %564 = vmatpush3.msra.mxu0 %v111_v14  ;;  %595 = vmatpush3.msra.mxu1 %v241_v29  ;;  %v380_v14 = vld [vmem:[#allocation12 + $0x48] sm:$0xff] }
  0x68   :  { %565 = vmatprep.subr.mxu0 %v815_v0  ;;  %596 = vmatprep.subr.mxu1 %v815_v0 }
  0x69   :  { %566 = vmatpush3.msra.mxu0 %v110_v15  ;;  %597 = vmatpush3.msra.mxu1 %v240_v30  ;;  %v379_v15 = vld [vmem:[#allocation12 + $0x40] sm:$0xff] }
  0x6a   :  { %567 = vmatprep.subr.mxu0 %v815_v0  ;;  %598 = vmatprep.subr.mxu1 %v815_v0 }
  0x6b   :  { %568 = vmatpush3.msra.mxu0 %v109_v16  ;;  %599 = vmatpush3.msra.mxu1 %v239_v31  ;;  %v378_v16 = vld [vmem:[#allocation12 + $0x38] sm:$0xff] }
  0x6c   :  { %570 = vmatmul.mubr.f32.vlgmr.msra.gmra.mxu0 %v108_v17  ;;  %607 = vmatprep.subr.mxu0 %v815_v0  ;;  %v377_v17 = vld [vmem:[#allocation12 + $0x30] sm:$0xff] }
  0x6d   :  { %639 = vmatprep.mubr.msk.f32.mxu0 %vm816_vm0, %v815_v0  ;;  %600 = vmatprep.subr.mxu1 %v815_v0 }
  0x6e   :  { %601 = vmatpush3.msra.mxu1 %v238_v32  ;;  %608 = vmatpush3.msra.mxu0 %v386_v8 }
  0x6f   :  { %602 = vmatprep.subr.mxu1 %v815_v0  ;;  %609 = vmatprep.subr.mxu0 %v815_v0 }
  0x70   :  { %603 = vmatpush3.msra.mxu1 %v237_v33  ;;  %610 = vmatpush3.msra.mxu0 %v385_v9 }
  0x71   :  { %611 = vmatprep.subr.mxu0 %v815_v0 }
  0x72   :  { %612 = vmatpush3.msra.mxu0 %v384_v10 }
  0x73   :  { %613 = vmatprep.subr.mxu0 %v815_v0 }
  0x74   :  { %614 = vmatpush3.msra.mxu0 %v383_v11 }
  0x75   :  { %615 = vmatprep.subr.mxu0 %v815_v0 }
  0x76   :  { %616 = vmatpush3.msra.mxu0 %v382_v12 }
  0x77   :  { %617 = vmatprep.subr.mxu0 %v815_v0 }
  0x78   :  { %618 = vmatpush3.msra.mxu0 %v381_v13 }
  0x79   :  { %619 = vmatprep.subr.mxu0 %v815_v0 }
  0x7a   :  { %620 = vmatpush3.msra.mxu0 %v380_v14 }
  0x7b   :  { %621 = vmatprep.subr.mxu0 %v815_v0 }
  0x7c   :  { %622 = vmatpush3.msra.mxu0 %v379_v15 }
  0x7d   :  { %623 = vmatprep.subr.mxu0 %v815_v0 }
  0x7e   :  { %624 = vmatpush3.msra.mxu0 %v378_v16 }
  0x7f   :  { %625 = vmatprep.subr.mxu0 %v815_v0 }
  0x80   :  { %626 = vmatpush3.msra.mxu0 %v377_v17 }
  0x81   :  { %627 = vmatprep.subr.mxu0 %v815_v0 }
  0x82   :  { %628 = vmatpush3.msra.mxu0 %v376_v18 }
  0x83   :  { %629 = vmatprep.subr.mxu0 %v815_v0 }
  0x84   :  { %630 = vmatpush3.msra.mxu0 %v375_v19 }
  0x85   :  { %631 = vmatprep.subr.mxu0 %v815_v0 }
  0x86   :  { %632 = vmatpush3.msra.mxu0 %v374_v20 }
  0x87   :  { %633 = vmatprep.subr.mxu0 %v815_v0 }
  0x88   :  { %634 = vmatpush3.msra.mxu0 %v373_v21 }
  0x89   :  { %635 = vmatprep.subr.mxu0 %v815_v0 }
  0x8a   :  { %636 = vmatpush3.msra.mxu0 %v372_v22 }
  0x8b   :  { %637 = vmatprep.subr.mxu0 %v815_v0 }
  0x8c   :  { %638 = vmatpush3.msra.mxu0 %v371_v23 }
 0x12c   :  { %v196_v35 = vpop.f32.mrf.mxu0 }
 0x12d   :  { %v197_v36 = vadd.f32 %v483_v34, %v196_v35 }
 0x12e   :  { %v571_v37 = vpop.f32.mrf.mxu0 }
 0x12f   :  { %v200_v38 = vmax.f32 %v197_v36, 0.0 }
 0x131   :  { %v201_v39 = vrot.slane %v200_v38, 4  ;;  %v208_v40 = vmul.f32 %v200_v38, %v200_v38 }
 0x133   :  { %v202_v41 = vadd.f32 %v201_v39, %v200_v38  ;;  %v209_v42 = vrot.slane %v208_v40, 4 }
 0x135   :  { %v203_v43 = vrot.slane %v202_v41, 2  ;;  %v210_v44 = vadd.f32 %v209_v42, %v208_v40 }
 0x137   :  { %v204_v45 = vadd.f32 %v203_v43, %v202_v41  ;;  %v211_v46 = vrot.slane %v210_v44, 2 }
 0x139   :  { %v205_v47 = vrot.slane %v204_v45, 1  ;;  %v212_v48 = vadd.f32 %v211_v46, %v210_v44 }
 0x13b   :  { %v213_v49 = vrot.slane %v212_v48, 1  ;;  %v206_v50 = vadd.f32 %v205_v47, %v204_v45  ;;  %v354_v47 = vld [vmem:[#allocation11 + $0x1] sm:$0x1] }
 0x13d   :  { %v214_v51 = vadd.f32 %v213_v49, %v212_v48  ;;  %v207_v52 = vmul.f32 0.125, %v206_v50  ;;  %v358_v50 = vld [vmem:[#allocation11 + $0x2] sm:$0x1] }
 0x13f   :  { %v215_v53 = vmul.f32 0.125, %v214_v51  ;;  %v216_v54 = vmul.f32 %v207_v52, %v207_v52 }
 0x141   :  { %v217_v55 = vsub.f32 %v215_v53, %v216_v54 }
 0x143   :  { %v218_v56 = vmax.f32 %v217_v55, 0.0 }
 0x145   :  { %v220_v57 = vadd.f32 1e-05, %v218_v56 }
 0x147   :  { %653 = vrsqrt.f32 %v220_v57  ;;  %v485_v57 = vld [vmem:[%s957_s6] ss:$0 sm:$0xff] }
 0x154   :  { %v654_v62 = vpop.eup %653 }
 0x155   :  { %v222_v63 = vmul.f32 %v654_v62, %v219_v60 }
 0x157   :  { %v224_v2 = vmul.f32 %v222_v63, %v207_v52  ;;  %v229_v3 = vrot.slane %v222_v63, %v924_v61 }
 0x159   :  { %v225_v4 = vsub.f32 %v223_v1, %v224_v2  ;;  %v230_v5 = vmul.f32 %v229_v3, %v200_v38 }
 0x15b   :  { %v234_v6 = vrot.slane %v225_v4, %v924_v61 }
 0x15d   :  { %v235_v7 = vadd.f32 %v234_v6, %v230_v5 }
 0x15f   :  { %605 = vmatmul.mubr.f32.vlgmr.msra.gmra.mxu1 %v235_v7 }
 0x21f   :  { %v319_v25 = vpop.f32.mrf.mxu1 }
 0x220   :  { %v334_v26 = vadd.f32 %v484_v24, %v319_v25 }
 0x221   :  { %v606_v27 = vpop.f32.mrf.mxu1 }
 0x222   :  { %v335_v28 = vmax.f32 %v334_v26, 0.0 }
 0x224   :  { %v336_v29 = vrot.slane %v335_v28, 4  ;;  %v343_v30 = vmul.f32 %v335_v28, %v335_v28 }
 0x226   :  { %v337_v31 = vadd.f32 %v336_v29, %v335_v28  ;;  %v344_v32 = vrot.slane %v343_v30, 4 }
 0x228   :  { %v338_v33 = vrot.slane %v337_v31, 2  ;;  %v345_v34 = vadd.f32 %v344_v32, %v343_v30 }
 0x22a   :  { %v339_v35 = vadd.f32 %v338_v33, %v337_v31  ;;  %v346_v36 = vrot.slane %v345_v34, 2 }
 0x22c   :  { %v340_v37 = vrot.slane %v339_v35, 1  ;;  %v347_v38 = vadd.f32 %v346_v36, %v345_v34 }
 0x22e   :  { %v341_v39 = vadd.f32 %v340_v37, %v339_v35  ;;  %v348_v40 = vrot.slane %v347_v38, 1 }
 0x230   :  { %v342_v41 = vmul.f32 0.125, %v341_v39  ;;  %v349_v0 = vadd.f32 %v348_v40, %v347_v38 }
 0x232   :  { %v350_v42 = vmul.f32 0.125, %v349_v0  ;;  %v351_v43 = vmul.f32 %v342_v41, %v342_v41 }
 0x234   :  { %v352_v44 = vsub.f32 %v350_v42, %v351_v43 }
 0x236   :  { %v353_v45 = vmax.f32 %v352_v44, 0.0 }
 0x238   :  { %v355_v46 = vadd.f32 1e-05, %v353_v45 }
 0x23a   :  { %655 = vrsqrt.f32 %v355_v46 }
 0x247   :  { %v656_v48 = vpop.eup %655 }
 0x248   :  { %v357_v49 = vmul.f32 %v656_v48, %v354_v47 }
 0x24a   :  { %v364_v51 = vrot.slane %v357_v49, %v924_v61  ;;  %v359_v52 = vmul.f32 %v357_v49, %v342_v41 }
 0x24c   :  { %v360_v53 = vsub.f32 %v358_v50, %v359_v52  ;;  %v365_v54 = vmul.f32 %v364_v51, %v335_v28 }
 0x24e   :  { %v369_v55 = vrot.slane %v360_v53, %v924_v61 }
 0x250   :  { %v370_v56 = vadd.f32 %v369_v55, %v365_v54 }
 0x252   :  { %640 = vmatmul.mubr.f32.vlgmr.msra.gmra.mxu0 %v370_v56 }
 0x312   :  { %v460_v58 = vpop.f32.mrf.mxu0 }
 0x313   :  { %v461_v59 = vadd.f32 %v485_v57, %v460_v58 }
 0x314   :  { %v641_v60 = vpop.f32.mrf.mxu0 }
 0x315   :  { %464 = vst [vmem:[#allocation14] sm:$0xff] %v461_v59 }
 0x316   :  { %788 = shalt.err (!%p785_p6)
}
 0x317   :  { %474 = dma.vmem_to_hbm [thread:$0]  %s472_s28, 128, %s958_s7, [#allocation5]  }
 0x318   :  { %805 = dma.done.wait [#allocation5], 128  }
 0x319   :  { %806 = vsyncadd [#allocation5], 4294967168 }
 0x31a   :  { %478 = vsyncpa [#allocation4], 1 }
 0x31b   :  { %479 = vsyncpa [#allocation7], 1 }
 0x31c   :  { %480 = vsyncpa [#allocation10], 1 }
 0x31d   :  { %481 = vsyncpa [#allocation13], 1 }
 0x31e   :  { %482 = vsyncpa [#allocation5], 1 }

</bundles_post_ra>
